<compile_context>
chip_gen: v7x
topology: tpu7x:2x2x1
jax: 0.10.0
libtpu: 0.0.40
codegen_flags: <defaults>
</compile_context>

<pallas_src>
import functools

import jax
import jax.numpy as jnp
from jax import lax
from jax.experimental import pallas as pl
from jax.experimental.pallas import tpu as pltpu  # noqa: F401  (TPU backend)


def _gru_kernel(x_ref,     # (T*BP, I)  time-major flattened input rows (batch padded to BP)
                wi_ref,    # (I, 3H)    input weights, gate columns ordered r|z|n
                wh_ref,    # (H, 3H)    hidden weights, gate columns ordered r|z|n
                b_ref,     # (2, 3H)    row0 = [b_ir+b_hr, b_iz+b_hz, b_in], row1 = [0, 0, b_hn]
                h0_ref,    # (BP, H)    initial hidden state (batch padded)
                hs_ref,    # (BP, T*H)  output: hidden states, lane-dense slab
                *, seq_len, store_group, mxu_dtype):
    BP, H = h0_ref.shape
    H2 = 2 * H
    H3 = 3 * H

    wi = wi_ref[...].astype(mxu_dtype)
    wh = wh_ref[...].astype(mxu_dtype)
    b = b_ref[...].astype(jnp.float32)
    bx = b[0:1, :]                                   # (1, 3H) folded input-side bias
    # Hoist the h-side bias broadcast out of the unrolled loop.
    bh_b = jnp.broadcast_to(b[1:2, :], (BP, H3))     # (BP, 3H), only n-gate nonzero

    # Input projection for every timestep at once: one MXU push chain.
    x_all = x_ref[...].astype(mxu_dtype)                                   # (T*BP, I)
    gx_all = jnp.dot(x_all, wi, preferred_element_type=jnp.float32) + bx    # (T*BP, 3H)

    h = h0_ref[...].astype(jnp.float32)                                     # (BP, H)
    pend = []       # timesteps waiting to be stored as one 128-lane-dense block
    start = 0
    for t in range(seq_len):             # fully unrolled, all offsets static
        gx = gx_all[t * BP:(t + 1) * BP]                                    # (BP, 3H)
        gh = jnp.dot(h.astype(mxu_dtype), wh,
                     preferred_element_type=jnp.float32) + bh_b             # (BP, 3H)
        # One fused sigmoid launch for both r and z gates (2H lanes).
        rz = jax.nn.sigmoid(gx[:, :H2] + gh[:, :H2])
        r = rz[:, :H]
        zg = rz[:, H:]
        n = jnp.tanh(gx[:, H2:] + r * gh[:, H2:])                           # b_hn already in gh
        h = (1.0 - zg) * n + zg * h

        pend.append(h)
        if len(pend) == store_group or t == seq_len - 1:
            blk = pend[0] if len(pend) == 1 else jnp.concatenate(pend, axis=1)
            hs_ref[:, start * H:(start + len(pend)) * H] = blk.astype(hs_ref.dtype)
            start = t + 1
            pend = []


def gru_decode_pallas(x, z, params, *, mxu_dtype=jnp.float32):
    """Pallas GRU forward matching torch.nn.GRU(batch_first=True, num_layers=1).

    x: (B, T, I) input sequence
    z: (1, B, H) initial hidden state
    params: dict with W_ih (3H, I), W_hh (3H, H), b_ih (3H,), b_hh (3H,)
    mxu_dtype: dtype of MXU operands (f32 exact; bf16 faster, ~1e-2 agreement)
    returns (hs (B, T, H), last_h (1, B, H))
    """
    B, T, I = x.shape
    H = z.shape[-1]

    W_ih, W_hh = params["W_ih"], params["W_hh"]
    b_ih, b_hh = params["b_ih"], params["b_hh"]

    # Fused, pre-transposed weights: columns ordered r|z|n.
    wi = W_ih.T                                   # (I, 3H)
    wh = W_hh.T                                   # (H, 3H)

    # Fold the linearly-additive biases (r, z gates); keep b_hn on the h side
    # because PyTorch gates it with r: n = tanh(Win x + bin + r*(Whn h + bhn)).
    bias_x = jnp.concatenate([b_ih[:H] + b_hh[:H],
                              b_ih[H:2 * H] + b_hh[H:2 * H],
                              b_ih[2 * H:]])[None]                      # (1, 3H)
    bias_h = jnp.concatenate([jnp.zeros((2 * H,), b_hh.dtype),
                              b_hh[2 * H:]])[None]                      # (1, 3H)
    bias = jnp.concatenate([bias_x, bias_h], axis=0)                    # (2, 3H)

    # Pad batch to a full sublane tile (multiple of 8): compute on the padded
    # rows is free, and all per-step slices / stores become tile-aligned.
    BP = max(8, -(-B // 8) * 8)
    pad = BP - B
    x_p = jnp.pad(x, ((0, pad), (0, 0), (0, 0))) if pad else x
    h0 = z[0]                                                           # (B, H)
    h0_p = jnp.pad(h0, ((0, pad), (0, 0))) if pad else h0               # (BP, H)

    # Time-major rows: row t*BP + b is timestep t of (padded) batch element b.
    x_tm = jnp.transpose(x_p, (1, 0, 2)).reshape(T * BP, I)

    # Pack timesteps so each in-kernel output store covers a full 128-lane tile.
    store_group = (128 // H) if (H <= 128 and 128 % H == 0) else 1

    # No grid: whole (tiny) operands live in VMEM, kernel runs once, and the
    # (BP, T*H) output slab is written back with a single DMA.
    hs_flat = pl.pallas_call(
        functools.partial(_gru_kernel, seq_len=T, store_group=store_group,
                          mxu_dtype=mxu_dtype),
        out_shape=jax.ShapeDtypeStruct((BP, T * H), x.dtype),
    )(x_tm, wi, wh, bias, h0_p)

    hs = hs_flat[:B].reshape(B, T, H)             # drop batch padding, batch_first
    last_h = hs[:, -1, :][None]                   # (1, B, H)
    return hs, last_h


def gru_decode_ref(x, z, params):
    """Pure-JAX reference (lax.scan) matching torch.nn.GRU semantics."""
    H = z.shape[-1]
    W_ih, W_hh = params["W_ih"], params["W_hh"]
    b_ih, b_hh = params["b_ih"], params["b_hh"]
    Wir, Wiz, Win = W_ih[:H], W_ih[H:2 * H], W_ih[2 * H:]
    Whr, Whz, Whn = W_hh[:H], W_hh[H:2 * H], W_hh[2 * H:]
    bir, biz, bin_ = b_ih[:H], b_ih[H:2 * H], b_ih[2 * H:]
    bhr, bhz, bhn = b_hh[:H], b_hh[H:2 * H], b_hh[2 * H:]

    def step(h, x_t):
        r = jax.nn.sigmoid(x_t @ Wir.T + bir + h @ Whr.T + bhr)
        zg = jax.nn.sigmoid(x_t @ Wiz.T + biz + h @ Whz.T + bhz)
        n = jnp.tanh(x_t @ Win.T + bin_ + r * (h @ Whn.T + bhn))
        h_new = (1.0 - zg) * n + zg * h
        return h_new, h_new

    x_tm = jnp.transpose(x, (1, 0, 2))
    last_h, hs_tm = lax.scan(step, z[0], x_tm)
    return jnp.transpose(hs_tm, (1, 0, 2)), last_h[None]


def init_params(key, input_size, hidden):
    # PyTorch nn.GRU init: U(-1/sqrt(H), 1/sqrt(H)) for all weights and biases.
    k = 1.0 / jnp.sqrt(jnp.asarray(hidden, jnp.float32))
    keys = jax.random.split(key, 4)
    return {
        "W_ih": jax.random.uniform(keys[0], (3 * hidden, input_size), jnp.float32, -k, k),
        "W_hh": jax.random.uniform(keys[1], (3 * hidden, hidden), jnp.float32, -k, k),
        "b_ih": jax.random.uniform(keys[2], (3 * hidden,), jnp.float32, -k, k),
        "b_hh": jax.random.uniform(keys[3], (3 * hidden,), jnp.float32, -k, k),
    }


if __name__ == "__main__":
    B, T, I, H = 2, 8, 16, 32          # batch, seq, input_size, latent_dim

    root = jax.random.PRNGKey(0)
    k_x, k_z, k_p = jax.random.split(root, 3)
    x = jax.random.normal(k_x, (B, T, I), jnp.float32)      # soft/real input sequence
    z = jax.random.normal(k_z, (1, B, H), jnp.float32)      # latent content repr (h0)
    params = init_params(k_p, I, H)

    # f32 MXU operands for the exactness test (bf16 is available via mxu_dtype
    # for production, at ~1e-2 agreement).
    fwd = jax.jit(functools.partial(gru_decode_pallas, params=params))
    hs, last_h = fwd(x, z)
    jax.block_until_ready((hs, last_h))

    hs_ref, last_h_ref = gru_decode_ref(x, z, params)
    assert hs.shape == (B, T, H) and last_h.shape == (1, B, H)
    assert jnp.allclose(hs, hs_ref, atol=1e-5, rtol=1e-5)
    assert jnp.allclose(last_h, last_h_ref, atol=1e-5, rtol=1e-5)
    print("KERNEL_OK")
</pallas_src>

<mosaic_0001>
module attributes {stable_mosaic.version = 11 : i64} {
  func.func @_gru_kernel(%arg0: memref<64x16xf32, #tpu.memory_space<vmem>>, %arg1: memref<16x96xf32, #tpu.memory_space<vmem>>, %arg2: memref<32x96xf32, #tpu.memory_space<vmem>>, %arg3: memref<2x96xf32, #tpu.memory_space<vmem>>, %arg4: memref<8x32xf32, #tpu.memory_space<vmem>>, %arg5: memref<8x256xf32, #tpu.memory_space<vmem>>) attributes {dimension_semantics = [], scalar_prefetch = 0 : i64, scratch_operands = 0 : i64, tpu.core_type = #tpu.core_type<tc>} {
    %c0 = arith.constant 0 : index
    %c0_0 = arith.constant 0 : index
    %0 = vector.load %arg1[%c0, %c0_0] : memref<16x96xf32, #tpu.memory_space<vmem>>, vector<16x96xf32>
    %c0_1 = arith.constant 0 : index
    %c0_2 = arith.constant 0 : index
    %1 = vector.load %arg2[%c0_1, %c0_2] : memref<32x96xf32, #tpu.memory_space<vmem>>, vector<32x96xf32>
    %c0_3 = arith.constant 0 : index
    %c0_4 = arith.constant 0 : index
    %2 = vector.load %arg3[%c0_3, %c0_4] : memref<2x96xf32, #tpu.memory_space<vmem>>, vector<2x96xf32>
    %3 = vector.extract_strided_slice %2 {offsets = [0, 0], sizes = [1, 96], strides = [1, 1]} : vector<2x96xf32> to vector<1x96xf32>
    %4 = vector.extract_strided_slice %2 {offsets = [1, 0], sizes = [1, 96], strides = [1, 1]} : vector<2x96xf32> to vector<1x96xf32>
    %5 = vector.shape_cast %4 : vector<1x96xf32> to vector<1x96xf32>
    %6 = vector.broadcast %5 : vector<1x96xf32> to vector<8x96xf32>
    %c0_5 = arith.constant 0 : index
    %c0_6 = arith.constant 0 : index
    %7 = vector.load %arg0[%c0_5, %c0_6] : memref<64x16xf32, #tpu.memory_space<vmem>>, vector<64x16xf32>
    %cst = arith.constant dense<0.000000e+00> : vector<64x96xf32>
    %8 = tpu.matmul %7, %0, %cst {dimension_numbers = #tpu.dot_dimension_numbers<[1], [0], [0], [1], [0, 0, 1, 1], [], []>} : vector<64x16xf32>, vector<16x96xf32>, vector<64x96xf32> -> vector<64x96xf32>
    %9 = vector.broadcast %3 : vector<1x96xf32> to vector<64x96xf32>
    %10 = arith.addf %8, %9 : vector<64x96xf32>
    %c0_7 = arith.constant 0 : index
    %c0_8 = arith.constant 0 : index
    %11 = vector.load %arg4[%c0_7, %c0_8] : memref<8x32xf32, #tpu.memory_space<vmem>>, vector<8x32xf32>
    %12 = vector.extract_strided_slice %10 {offsets = [0, 0], sizes = [8, 96], strides = [1, 1]} : vector<64x96xf32> to vector<8x96xf32>
    %cst_9 = arith.constant dense<0.000000e+00> : vector<8x96xf32>
    %13 = tpu.matmul %11, %1, %cst_9 {dimension_numbers = #tpu.dot_dimension_numbers<[1], [0], [0], [1], [0, 0, 1, 1], [], []>} : vector<8x32xf32>, vector<32x96xf32>, vector<8x96xf32> -> vector<8x96xf32>
    %14 = arith.addf %13, %6 : vector<8x96xf32>
    %15 = vector.extract_strided_slice %12 {offsets = [0, 0], sizes = [8, 64], strides = [1, 1]} : vector<8x96xf32> to vector<8x64xf32>
    %16 = vector.extract_strided_slice %14 {offsets = [0, 0], sizes = [8, 64], strides = [1, 1]} : vector<8x96xf32> to vector<8x64xf32>
    %17 = arith.addf %15, %16 : vector<8x64xf32>
    %18 = arith.negf %17 : vector<8x64xf32>
    %19 = math.exp %18 : vector<8x64xf32>
    %cst_10 = arith.constant 1.000000e+00 : f32
    %20 = vector.broadcast %cst_10 : f32 to vector<8x64xf32>
    %21 = arith.addf %20, %19 : vector<8x64xf32>
    %22 = arith.divf %20, %21 : vector<8x64xf32>
    %23 = vector.extract_strided_slice %22 {offsets = [0, 0], sizes = [8, 32], strides = [1, 1]} : vector<8x64xf32> to vector<8x32xf32>
    %24 = vector.extract_strided_slice %22 {offsets = [0, 32], sizes = [8, 32], strides = [1, 1]} : vector<8x64xf32> to vector<8x32xf32>
    %25 = vector.extract_strided_slice %12 {offsets = [0, 64], sizes = [8, 32], strides = [1, 1]} : vector<8x96xf32> to vector<8x32xf32>
    %26 = vector.extract_strided_slice %14 {offsets = [0, 64], sizes = [8, 32], strides = [1, 1]} : vector<8x96xf32> to vector<8x32xf32>
    %27 = arith.mulf %23, %26 : vector<8x32xf32>
    %28 = arith.addf %25, %27 : vector<8x32xf32>
    %29 = math.tanh %28 : vector<8x32xf32>
    %cst_11 = arith.constant 1.000000e+00 : f32
    %30 = vector.broadcast %cst_11 : f32 to vector<8x32xf32>
    %31 = arith.subf %30, %24 : vector<8x32xf32>
    %32 = arith.mulf %31, %29 : vector<8x32xf32>
    %33 = arith.mulf %24, %11 : vector<8x32xf32>
    %34 = arith.addf %32, %33 : vector<8x32xf32>
    %35 = vector.extract_strided_slice %10 {offsets = [8, 0], sizes = [8, 96], strides = [1, 1]} : vector<64x96xf32> to vector<8x96xf32>
    %cst_12 = arith.constant dense<0.000000e+00> : vector<8x96xf32>
    %36 = tpu.matmul %34, %1, %cst_12 {dimension_numbers = #tpu.dot_dimension_numbers<[1], [0], [0], [1], [0, 0, 1, 1], [], []>} : vector<8x32xf32>, vector<32x96xf32>, vector<8x96xf32> -> vector<8x96xf32>
    %37 = arith.addf %36, %6 : vector<8x96xf32>
    %38 = vector.extract_strided_slice %35 {offsets = [0, 0], sizes = [8, 64], strides = [1, 1]} : vector<8x96xf32> to vector<8x64xf32>
    %39 = vector.extract_strided_slice %37 {offsets = [0, 0], sizes = [8, 64], strides = [1, 1]} : vector<8x96xf32> to vector<8x64xf32>
    %40 = arith.addf %38, %39 : vector<8x64xf32>
    %41 = arith.negf %40 : vector<8x64xf32>
    %42 = math.exp %41 : vector<8x64xf32>
    %cst_13 = arith.constant 1.000000e+00 : f32
    %43 = vector.broadcast %cst_13 : f32 to vector<8x64xf32>
    %44 = arith.addf %43, %42 : vector<8x64xf32>
    %45 = arith.divf %43, %44 : vector<8x64xf32>
    %46 = vector.extract_strided_slice %45 {offsets = [0, 0], sizes = [8, 32], strides = [1, 1]} : vector<8x64xf32> to vector<8x32xf32>
    %47 = vector.extract_strided_slice %45 {offsets = [0, 32], sizes = [8, 32], strides = [1, 1]} : vector<8x64xf32> to vector<8x32xf32>
    %48 = vector.extract_strided_slice %35 {offsets = [0, 64], sizes = [8, 32], strides = [1, 1]} : vector<8x96xf32> to vector<8x32xf32>
    %49 = vector.extract_strided_slice %37 {offsets = [0, 64], sizes = [8, 32], strides = [1, 1]} : vector<8x96xf32> to vector<8x32xf32>
    %50 = arith.mulf %46, %49 : vector<8x32xf32>
    %51 = arith.addf %48, %50 : vector<8x32xf32>
    %52 = math.tanh %51 : vector<8x32xf32>
    %cst_14 = arith.constant 1.000000e+00 : f32
    %53 = vector.broadcast %cst_14 : f32 to vector<8x32xf32>
    %54 = arith.subf %53, %47 : vector<8x32xf32>
    %55 = arith.mulf %54, %52 : vector<8x32xf32>
    %56 = arith.mulf %47, %34 : vector<8x32xf32>
    %57 = arith.addf %55, %56 : vector<8x32xf32>
    %58 = vector.extract_strided_slice %10 {offsets = [16, 0], sizes = [8, 96], strides = [1, 1]} : vector<64x96xf32> to vector<8x96xf32>
    %cst_15 = arith.constant dense<0.000000e+00> : vector<8x96xf32>
    %59 = tpu.matmul %57, %1, %cst_15 {dimension_numbers = #tpu.dot_dimension_numbers<[1], [0], [0], [1], [0, 0, 1, 1], [], []>} : vector<8x32xf32>, vector<32x96xf32>, vector<8x96xf32> -> vector<8x96xf32>
    %60 = arith.addf %59, %6 : vector<8x96xf32>
    %61 = vector.extract_strided_slice %58 {offsets = [0, 0], sizes = [8, 64], strides = [1, 1]} : vector<8x96xf32> to vector<8x64xf32>
    %62 = vector.extract_strided_slice %60 {offsets = [0, 0], sizes = [8, 64], strides = [1, 1]} : vector<8x96xf32> to vector<8x64xf32>
    %63 = arith.addf %61, %62 : vector<8x64xf32>
    %64 = arith.negf %63 : vector<8x64xf32>
    %65 = math.exp %64 : vector<8x64xf32>
    %cst_16 = arith.constant 1.000000e+00 : f32
    %66 = vector.broadcast %cst_16 : f32 to vector<8x64xf32>
    %67 = arith.addf %66, %65 : vector<8x64xf32>
    %68 = arith.divf %66, %67 : vector<8x64xf32>
    %69 = vector.extract_strided_slice %68 {offsets = [0, 0], sizes = [8, 32], strides = [1, 1]} : vector<8x64xf32> to vector<8x32xf32>
    %70 = vector.extract_strided_slice %68 {offsets = [0, 32], sizes = [8, 32], strides = [1, 1]} : vector<8x64xf32> to vector<8x32xf32>
    %71 = vector.extract_strided_slice %58 {offsets = [0, 64], sizes = [8, 32], strides = [1, 1]} : vector<8x96xf32> to vector<8x32xf32>
    %72 = vector.extract_strided_slice %60 {offsets = [0, 64], sizes = [8, 32], strides = [1, 1]} : vector<8x96xf32> to vector<8x32xf32>
    %73 = arith.mulf %69, %72 : vector<8x32xf32>
    %74 = arith.addf %71, %73 : vector<8x32xf32>
    %75 = math.tanh %74 : vector<8x32xf32>
    %cst_17 = arith.constant 1.000000e+00 : f32
    %76 = vector.broadcast %cst_17 : f32 to vector<8x32xf32>
    %77 = arith.subf %76, %70 : vector<8x32xf32>
    %78 = arith.mulf %77, %75 : vector<8x32xf32>
    %79 = arith.mulf %70, %57 : vector<8x32xf32>
    %80 = arith.addf %78, %79 : vector<8x32xf32>
    %81 = vector.extract_strided_slice %10 {offsets = [24, 0], sizes = [8, 96], strides = [1, 1]} : vector<64x96xf32> to vector<8x96xf32>
    %cst_18 = arith.constant dense<0.000000e+00> : vector<8x96xf32>
    %82 = tpu.matmul %80, %1, %cst_18 {dimension_numbers = #tpu.dot_dimension_numbers<[1], [0], [0], [1], [0, 0, 1, 1], [], []>} : vector<8x32xf32>, vector<32x96xf32>, vector<8x96xf32> -> vector<8x96xf32>
    %83 = arith.addf %82, %6 : vector<8x96xf32>
    %84 = vector.extract_strided_slice %81 {offsets = [0, 0], sizes = [8, 64], strides = [1, 1]} : vector<8x96xf32> to vector<8x64xf32>
    %85 = vector.extract_strided_slice %83 {offsets = [0, 0], sizes = [8, 64], strides = [1, 1]} : vector<8x96xf32> to vector<8x64xf32>
    %86 = arith.addf %84, %85 : vector<8x64xf32>
    %87 = arith.negf %86 : vector<8x64xf32>
    %88 = math.exp %87 : vector<8x64xf32>
    %cst_19 = arith.constant 1.000000e+00 : f32
    %89 = vector.broadcast %cst_19 : f32 to vector<8x64xf32>
    %90 = arith.addf %89, %88 : vector<8x64xf32>
    %91 = arith.divf %89, %90 : vector<8x64xf32>
    %92 = vector.extract_strided_slice %91 {offsets = [0, 0], sizes = [8, 32], strides = [1, 1]} : vector<8x64xf32> to vector<8x32xf32>
    %93 = vector.extract_strided_slice %91 {offsets = [0, 32], sizes = [8, 32], strides = [1, 1]} : vector<8x64xf32> to vector<8x32xf32>
    %94 = vector.extract_strided_slice %81 {offsets = [0, 64], sizes = [8, 32], strides = [1, 1]} : vector<8x96xf32> to vector<8x32xf32>
    %95 = vector.extract_strided_slice %83 {offsets = [0, 64], sizes = [8, 32], strides = [1, 1]} : vector<8x96xf32> to vector<8x32xf32>
    %96 = arith.mulf %92, %95 : vector<8x32xf32>
    %97 = arith.addf %94, %96 : vector<8x32xf32>
    %98 = math.tanh %97 : vector<8x32xf32>
    %cst_20 = arith.constant 1.000000e+00 : f32
    %99 = vector.broadcast %cst_20 : f32 to vector<8x32xf32>
    %100 = arith.subf %99, %93 : vector<8x32xf32>
    %101 = arith.mulf %100, %98 : vector<8x32xf32>
    %102 = arith.mulf %93, %80 : vector<8x32xf32>
    %103 = arith.addf %101, %102 : vector<8x32xf32>
    %104 = tpu.concatenate %34, %57, %80, %103 in 1 : vector<8x32xf32>, vector<8x32xf32>, vector<8x32xf32>, vector<8x32xf32> -> vector<8x128xf32>
    %c0_21 = arith.constant 0 : index
    %c0_22 = arith.constant 0 : index
    %105 = vector.load %arg5[%c0_21, %c0_22] : memref<8x256xf32, #tpu.memory_space<vmem>>, vector<8x128xf32>
    tpu.vector_store %arg5[%c0_21, %c0_22], %104 {strides = array<i32>} : memref<8x256xf32, #tpu.memory_space<vmem>>, vector<8x128xf32>,
    %106 = vector.extract_strided_slice %10 {offsets = [32, 0], sizes = [8, 96], strides = [1, 1]} : vector<64x96xf32> to vector<8x96xf32>
    %cst_23 = arith.constant dense<0.000000e+00> : vector<8x96xf32>
    %107 = tpu.matmul %103, %1, %cst_23 {dimension_numbers = #tpu.dot_dimension_numbers<[1], [0], [0], [1], [0, 0, 1, 1], [], []>} : vector<8x32xf32>, vector<32x96xf32>, vector<8x96xf32> -> vector<8x96xf32>
    %108 = arith.addf %107, %6 : vector<8x96xf32>
    %109 = vector.extract_strided_slice %106 {offsets = [0, 0], sizes = [8, 64], strides = [1, 1]} : vector<8x96xf32> to vector<8x64xf32>
    %110 = vector.extract_strided_slice %108 {offsets = [0, 0], sizes = [8, 64], strides = [1, 1]} : vector<8x96xf32> to vector<8x64xf32>
    %111 = arith.addf %109, %110 : vector<8x64xf32>
    %112 = arith.negf %111 : vector<8x64xf32>
    %113 = math.exp %112 : vector<8x64xf32>
    %cst_24 = arith.constant 1.000000e+00 : f32
    %114 = vector.broadcast %cst_24 : f32 to vector<8x64xf32>
    %115 = arith.addf %114, %113 : vector<8x64xf32>
    %116 = arith.divf %114, %115 : vector<8x64xf32>
    %117 = vector.extract_strided_slice %116 {offsets = [0, 0], sizes = [8, 32], strides = [1, 1]} : vector<8x64xf32> to vector<8x32xf32>
    %118 = vector.extract_strided_slice %116 {offsets = [0, 32], sizes = [8, 32], strides = [1, 1]} : vector<8x64xf32> to vector<8x32xf32>
    %119 = vector.extract_strided_slice %106 {offsets = [0, 64], sizes = [8, 32], strides = [1, 1]} : vector<8x96xf32> to vector<8x32xf32>
    %120 = vector.extract_strided_slice %108 {offsets = [0, 64], sizes = [8, 32], strides = [1, 1]} : vector<8x96xf32> to vector<8x32xf32>
    %121 = arith.mulf %117, %120 : vector<8x32xf32>
    %122 = arith.addf %119, %121 : vector<8x32xf32>
    %123 = math.tanh %122 : vector<8x32xf32>
    %cst_25 = arith.constant 1.000000e+00 : f32
    %124 = vector.broadcast %cst_25 : f32 to vector<8x32xf32>
    %125 = arith.subf %124, %118 : vector<8x32xf32>
    %126 = arith.mulf %125, %123 : vector<8x32xf32>
    %127 = arith.mulf %118, %103 : vector<8x32xf32>
    %128 = arith.addf %126, %127 : vector<8x32xf32>
    %129 = vector.extract_strided_slice %10 {offsets = [40, 0], sizes = [8, 96], strides = [1, 1]} : vector<64x96xf32> to vector<8x96xf32>
    %cst_26 = arith.constant dense<0.000000e+00> : vector<8x96xf32>
    %130 = tpu.matmul %128, %1, %cst_26 {dimension_numbers = #tpu.dot_dimension_numbers<[1], [0], [0], [1], [0, 0, 1, 1], [], []>} : vector<8x32xf32>, vector<32x96xf32>, vector<8x96xf32> -> vector<8x96xf32>
    %131 = arith.addf %130, %6 : vector<8x96xf32>
    %132 = vector.extract_strided_slice %129 {offsets = [0, 0], sizes = [8, 64], strides = [1, 1]} : vector<8x96xf32> to vector<8x64xf32>
    %133 = vector.extract_strided_slice %131 {offsets = [0, 0], sizes = [8, 64], strides = [1, 1]} : vector<8x96xf32> to vector<8x64xf32>
    %134 = arith.addf %132, %133 : vector<8x64xf32>
    %135 = arith.negf %134 : vector<8x64xf32>
    %136 = math.exp %135 : vector<8x64xf32>
    %cst_27 = arith.constant 1.000000e+00 : f32
    %137 = vector.broadcast %cst_27 : f32 to vector<8x64xf32>
    %138 = arith.addf %137, %136 : vector<8x64xf32>
    %139 = arith.divf %137, %138 : vector<8x64xf32>
    %140 = vector.extract_strided_slice %139 {offsets = [0, 0], sizes = [8, 32], strides = [1, 1]} : vector<8x64xf32> to vector<8x32xf32>
    %141 = vector.extract_strided_slice %139 {offsets = [0, 32], sizes = [8, 32], strides = [1, 1]} : vector<8x64xf32> to vector<8x32xf32>
    %142 = vector.extract_strided_slice %129 {offsets = [0, 64], sizes = [8, 32], strides = [1, 1]} : vector<8x96xf32> to vector<8x32xf32>
    %143 = vector.extract_strided_slice %131 {offsets = [0, 64], sizes = [8, 32], strides = [1, 1]} : vector<8x96xf32> to vector<8x32xf32>
    %144 = arith.mulf %140, %143 : vector<8x32xf32>
    %145 = arith.addf %142, %144 : vector<8x32xf32>
    %146 = math.tanh %145 : vector<8x32xf32>
    %cst_28 = arith.constant 1.000000e+00 : f32
    %147 = vector.broadcast %cst_28 : f32 to vector<8x32xf32>
    %148 = arith.subf %147, %141 : vector<8x32xf32>
    %149 = arith.mulf %148, %146 : vector<8x32xf32>
    %150 = arith.mulf %141, %128 : vector<8x32xf32>
    %151 = arith.addf %149, %150 : vector<8x32xf32>
    %152 = vector.extract_strided_slice %10 {offsets = [48, 0], sizes = [8, 96], strides = [1, 1]} : vector<64x96xf32> to vector<8x96xf32>
    %cst_29 = arith.constant dense<0.000000e+00> : vector<8x96xf32>
    %153 = tpu.matmul %151, %1, %cst_29 {dimension_numbers = #tpu.dot_dimension_numbers<[1], [0], [0], [1], [0, 0, 1, 1], [], []>} : vector<8x32xf32>, vector<32x96xf32>, vector<8x96xf32> -> vector<8x96xf32>
    %154 = arith.addf %153, %6 : vector<8x96xf32>
    %155 = vector.extract_strided_slice %152 {offsets = [0, 0], sizes = [8, 64], strides = [1, 1]} : vector<8x96xf32> to vector<8x64xf32>
    %156 = vector.extract_strided_slice %154 {offsets = [0, 0], sizes = [8, 64], strides = [1, 1]} : vector<8x96xf32> to vector<8x64xf32>
    %157 = arith.addf %155, %156 : vector<8x64xf32>
    %158 = arith.negf %157 : vector<8x64xf32>
    %159 = math.exp %158 : vector<8x64xf32>
    %cst_30 = arith.constant 1.000000e+00 : f32
    %160 = vector.broadcast %cst_30 : f32 to vector<8x64xf32>
    %161 = arith.addf %160, %159 : vector<8x64xf32>
    %162 = arith.divf %160, %161 : vector<8x64xf32>
    %163 = vector.extract_strided_slice %162 {offsets = [0, 0], sizes = [8, 32], strides = [1, 1]} : vector<8x64xf32> to vector<8x32xf32>
    %164 = vector.extract_strided_slice %162 {offsets = [0, 32], sizes = [8, 32], strides = [1, 1]} : vector<8x64xf32> to vector<8x32xf32>
    %165 = vector.extract_strided_slice %152 {offsets = [0, 64], sizes = [8, 32], strides = [1, 1]} : vector<8x96xf32> to vector<8x32xf32>
    %166 = vector.extract_strided_slice %154 {offsets = [0, 64], sizes = [8, 32], strides = [1, 1]} : vector<8x96xf32> to vector<8x32xf32>
    %167 = arith.mulf %163, %166 : vector<8x32xf32>
    %168 = arith.addf %165, %167 : vector<8x32xf32>
    %169 = math.tanh %168 : vector<8x32xf32>
    %cst_31 = arith.constant 1.000000e+00 : f32
    %170 = vector.broadcast %cst_31 : f32 to vector<8x32xf32>
    %171 = arith.subf %170, %164 : vector<8x32xf32>
    %172 = arith.mulf %171, %169 : vector<8x32xf32>
    %173 = arith.mulf %164, %151 : vector<8x32xf32>
    %174 = arith.addf %172, %173 : vector<8x32xf32>
    %175 = vector.extract_strided_slice %10 {offsets = [56, 0], sizes = [8, 96], strides = [1, 1]} : vector<64x96xf32> to vector<8x96xf32>
    %cst_32 = arith.constant dense<0.000000e+00> : vector<8x96xf32>
    %176 = tpu.matmul %174, %1, %cst_32 {dimension_numbers = #tpu.dot_dimension_numbers<[1], [0], [0], [1], [0, 0, 1, 1], [], []>} : vector<8x32xf32>, vector<32x96xf32>, vector<8x96xf32> -> vector<8x96xf32>
    %177 = arith.addf %176, %6 : vector<8x96xf32>
    %178 = vector.extract_strided_slice %175 {offsets = [0, 0], sizes = [8, 64], strides = [1, 1]} : vector<8x96xf32> to vector<8x64xf32>
    %179 = vector.extract_strided_slice %177 {offsets = [0, 0], sizes = [8, 64], strides = [1, 1]} : vector<8x96xf32> to vector<8x64xf32>
    %180 = arith.addf %178, %179 : vector<8x64xf32>
    %181 = arith.negf %180 : vector<8x64xf32>
    %182 = math.exp %181 : vector<8x64xf32>
    %cst_33 = arith.constant 1.000000e+00 : f32
    %183 = vector.broadcast %cst_33 : f32 to vector<8x64xf32>
    %184 = arith.addf %183, %182 : vector<8x64xf32>
    %185 = arith.divf %183, %184 : vector<8x64xf32>
    %186 = vector.extract_strided_slice %185 {offsets = [0, 0], sizes = [8, 32], strides = [1, 1]} : vector<8x64xf32> to vector<8x32xf32>
    %187 = vector.extract_strided_slice %185 {offsets = [0, 32], sizes = [8, 32], strides = [1, 1]} : vector<8x64xf32> to vector<8x32xf32>
    %188 = vector.extract_strided_slice %175 {offsets = [0, 64], sizes = [8, 32], strides = [1, 1]} : vector<8x96xf32> to vector<8x32xf32>
    %189 = vector.extract_strided_slice %177 {offsets = [0, 64], sizes = [8, 32], strides = [1, 1]} : vector<8x96xf32> to vector<8x32xf32>
    %190 = arith.mulf %186, %189 : vector<8x32xf32>
    %191 = arith.addf %188, %190 : vector<8x32xf32>
    %192 = math.tanh %191 : vector<8x32xf32>
    %cst_34 = arith.constant 1.000000e+00 : f32
    %193 = vector.broadcast %cst_34 : f32 to vector<8x32xf32>
    %194 = arith.subf %193, %187 : vector<8x32xf32>
    %195 = arith.mulf %194, %192 : vector<8x32xf32>
    %196 = arith.mulf %187, %174 : vector<8x32xf32>
    %197 = arith.addf %195, %196 : vector<8x32xf32>
    %198 = tpu.concatenate %128, %151, %174, %197 in 1 : vector<8x32xf32>, vector<8x32xf32>, vector<8x32xf32>, vector<8x32xf32> -> vector<8x128xf32>
    %c0_35 = arith.constant 0 : index
    %c128 = arith.constant 128 : index
    %199 = vector.load %arg5[%c0_35, %c128] : memref<8x256xf32, #tpu.memory_space<vmem>>, vector<8x128xf32>
    tpu.vector_store %arg5[%c0_35, %c128], %198 {strides = array<i32>} : memref<8x256xf32, #tpu.memory_space<vmem>>, vector<8x128xf32>,
    return
  }
}

</mosaic_0001>

<bundles_post_ra>
// kernel: gru_decode_pallas.1
= control target key start
LH: loop header
LB: loop body
LE: loop exit
PB: predicated region body
PF: predicated region fallthrough
CT: control target
= control target key end

     0   :  { %v1297_v0 = vmov 0.0|0.0   ;;  %vm43_vm0 = vcmask 130048   ;;  %vm1298_vm1 = vmmov 0   ;;  %v1299_v4 = vmov 0.0   ;;  %s1300_s10 = smov 64   ;;  %s1302_s11 = smov 32   ;;  %s1557_s2 = inlined_call_operand.vmem [shape: f32[32,96], index: 2, kind: input, shape index: {}]   ;;  %s1558_s1 = inlined_call_operand.vmem [shape: f32[16,96], index: 1, kind: input, shape index: {}]   ;;  %s1559_s0 = inlined_call_operand.vmem [shape: f32[64,16], index: 0, kind: input, shape index: {}]   ;;  %s1560_s4 = inlined_call_operand.vmem [shape: f32[8,32], index: 4, kind: input, shape index: {}]   ;;  %s1561_s3 = inlined_call_operand.vmem [shape: f32[2,96], index: 3, kind: input, shape index: {}]   ;;  %s1562_s5 = inlined_call_operand.vmem [shape: f32[8,256], index: 5, kind: output, shape index: {}]  }
   0x1   :  { %1195 = vmatprep.subr.bf16.mxu1 %v1297_v0  ;;  %v22_v1 = vld [vmem:[%s1557_s2] sm:$0xff]  ;;  %v23_v2 = vld [vmem:[%s1557_s2 + $0x8] sm:$0xff]  ;;  %1111 = vmatprep.mubr.msk.f32.mxu1 %vm1298_vm1, %v1299_v4  ;;  %v24_v7 = vld [vmem:[%s1557_s2 + $0x10] sm:$0xff]  ;;  %vm174_vm2 = vcmask 261120   ;;  %v27_v14 = vlaneseq  ;;  %vm589_vm3 = vcmask 523264   ;;  %vm591_vm4 = vcmask 785408  }
   0x2   :  { %v20_v3 = vld [vmem:[%s1558_s1] sm:$0xff]  ;;  %v1345_v5 = vpack.c.bf16 %v23_v2, %v22_v1  ;;  %v21_v6 = vld [vmem:[%s1558_s1 + $0x8] sm:$0xff]  ;;  %v25_v8 = vld [vmem:[%s1557_s2 + $0x18] sm:$0xff] }
   0x3   :  { %v1191_v9 = vpack.c.bf16 %v21_v6, %v20_v3  ;;  %v31_v10 = vld [vmem:[%s1559_s0] sm:$0xff]  ;;  %v1360_v11 = vpack.c.bf16 %v25_v8, %v24_v7  ;;  %v32_v12 = vld [vmem:[%s1559_s0 + $0x8] sm:$0xff]  ;;  %v28_v15 = vshrl.u32 %v27_v14, 7  ;;  %v33_v57 = vld [vmem:[%s1559_s0 + $0x10] sm:$0xff] }
   0x4   :  { %1197 = vmatpush3.bf16.msra.mxu1 %v1345_v5  ;;  %1091 = vmatprep.mubr.msk.f32.mxu0 %vm43_vm0, %v31_v10  ;;  %v173_v13 = vld [vmem:[%s1560_s4] sm:$0xff]  ;;  %v34_v58 = vld [vmem:[%s1559_s0 + $0x18] sm:$0xff]  ;;  %v36_v60 = vld [vmem:[%s1559_s0 + $0x28] sm:$0xff] }
   0x5   :  { %1192 = vmatprep.subr.bf16.mxu0 %v1191_v9  ;;  %1198 = vmatprep.subr.bf16.mxu1 %v1297_v0  ;;  %v29_v16 = vsub.s32 1, %v28_v15  ;;  %v26_v17 = vld [vmem:[%s1561_s3] sm:$0x3]  ;;  %v41_v24 = vsub.s32 0, %v28_v15  ;;  %s1301_s3 = smov 96   ;;  %v37_v61 = vld [vmem:[%s1559_s0 + $0x30] sm:$0xff] }
   0x6   :  { %1194 = vmatpush3.bf16.msra.mxu0 %v1191_v9  ;;  %v35_v59 = vld [vmem:[%s1559_s0 + $0x20] sm:$0xff]  ;;  %v38_v62 = vld [vmem:[%s1559_s0 + $0x38] sm:$0xff] }
   0x7   :  { %1207 = vmatprep.subr.bf16.mxu0 %v1297_v0  ;;  %v1388_v18 = vrot.slane %v26_v17, %v29_v16  ;;  %v1392_v25 = vrot.slane %v26_v17, %v41_v24 }
   0x8   :  { %1200 = vmatpush3.bf16.msra.mxu1 %v1360_v11 }
   0x9   :  { %1092 = vmatmul.mubr.msk.f32.vlgmr.msra.gmra.mrb[0].mxu0 %vm43_vm0, %v32_v12  ;;  %1201 = vmatprep.subr.bf16.mxu1 %v1297_v0 }
   0xa   :  { %1209 = vmatpush3.bf16.msra.mxu0 %v1345_v5  ;;  %1094 = vmatprep.mubr.msk.f32.mxu0 %vm43_vm0, %v33_v57 }
   0xb   :  { %1112 = vmatmul.mubr.msk.f32.vlgmr.msra.gmra.mrb[0].mxu1 %vm174_vm2, %v173_v13  ;;  %1210 = vmatprep.subr.bf16.mxu0 %v1297_v0 }
   0xc   :  { %1203 = vmatpush3.bf16.msra.mxu1 %v1345_v5  ;;  %1122 = vmatprep.mubr.msk.f32.mxu1 %vm1298_vm1, %v1299_v4 }
   0xd   :  { %1204 = vmatprep.subr.bf16.mxu1 %v1297_v0  ;;  %1095 = vmatmul.mubr.msk.f32.gmra.mrb[2].mxu0 %vm43_vm0, %v34_v58 }
   0xe   :  { %1212 = vmatpush3.bf16.msra.mxu0 %v1360_v11  ;;  %1097 = vmatprep.mubr.msk.f32.mxu0 %vm43_vm0, %v35_v59 }
   0xf   :  { %1219 = vmatprep.subr.bf16.mxu0 %v1297_v0 }
  0x10   :  { %1206 = vmatpush3.bf16.msra.mxu1 %v1360_v11 }
  0x11   :  { %1213 = vmatprep.subr.bf16.mxu1 %v1297_v0  ;;  %1098 = vmatmul.mubr.msk.f32.gmra.mrb[4].mxu0 %vm43_vm0, %v36_v60 }
  0x12   :  { %1100 = vmatprep.mubr.msk.f32.mxu0 %vm43_vm0, %v37_v61 }
  0x15   :  { %1101 = vmatmul.mubr.msk.f32.gmra.mrb[6].mxu0 %vm43_vm0, %v38_v62 }
  0x16   :  { %1133 = vmatprep.mubr.msk.f32.mxu0 %vm1298_vm1, %v1299_v4 }
  0xdc   :  { %v1093_v19 = vpop.f32.mrb[0].mxu0 }
  0xdd   :  { %v134_v20 = vpop.f32.mrb[1].mxu0  ;;  %v140_v47 = vadd.f32 %v1093_v19, %v1392_v25 }
  0xde   :  { %v244_v21 = vpop.f32.mrb[0].mxu1  ;;  %v135_v26 = vadd.f32 %v134_v20, %v1392_v25 }
  0xdf   :  { %v245_v22 = vadd.f32 %v244_v21, %v1388_v18  ;;  %v1113_v23 = vpop.f32.mrb[1].mxu1 }
  0xe0   :  { %v1096_v8 = vpop.f32.mrb[2].mxu0 }
  0xe1   :  { %256 = vrot.lane.b32.xlu0 %v245_v22, %s1300_s10  ;;  %v248_v27 = vadd.f32 %v245_v22, %v135_v26  ;;  %v144_v9 = vpop.f32.mrb[3].mxu0 }
  0xe2   :  { %v145_v20 = vadd.f32 %v144_v9, %v1392_v25 }
  0xe3   :  { %v1022_v28 = vmul.f32 -1.442695, %v248_v27 }
  0xe4   :  { %v1444_v10 = vpop.f32.mrb[4].mxu0 }
  0xe5   :  { %1249 = vpow2.f32 %v1022_v28  ;;  %v1446_v12 = vpop.f32.mrb[5].mxu0 }
  0xe6   :  { %v155_v62 = vadd.f32 %v1446_v12, %v1392_v25 }
  0xef   :  { %v1250_v29 = vpop.eup %1249 }
  0xf0   :  { %v252_v30 = vadd.f32 1.0, %v1250_v29 }
  0xf2   :  { %1251 = vrcp.f32 %v252_v30 }
  0xfc   :  { %v1252_v31 = vpop.eup %1251 }
  0xfd   :  { %v266_v38 = vsub.f32 1.0, %v1252_v31 }
 0x153   :  { %v257_v32 = vpop.permute.xlu0 %256 }
 0x154   :  { %v259_v33 = vmul.f32 %v1252_v31, %v257_v32 }
 0x156   :  { %261 = vrot.lane.b32.xlu0 %v259_v33, %s1300_s10 }
 0x1c8   :  { %v262_v34 = vpop.permute.xlu0 %261 }
 0x1c9   :  { %v264_v35 = vadd.f32 %v262_v34, %v135_v26 }
 0x1cb   :  { %1253 = vtanh.f32 %v264_v35 }
 0x1d5   :  { %v1254_v36 = vpop.eup %1253 }
 0x1d6   :  { %268 = vrot.lane.b32.xlu1 %v1254_v36, %s1301_s3 }
 0x1da   :  { %272 = vrot.lane.b32.xlu1 %v173_v13, %s1302_s11  ;;  %v1448_v13 = vpop.f32.mrb[6].mxu0 }
 0x1db   :  { %v1450_v14 = vpop.f32.mrb[7].mxu0 }
 0x248   :  { %v269_v37 = vpop.permute.xlu1 %268 }
 0x249   :  { %v271_v40 = vmul.f32 %v269_v37, %v266_v38 }
 0x24c   :  { %v273_v39 = vpop.permute.xlu1 %272 }
 0x24d   :  { %v275_v41 = vmul.f32 %v1252_v31, %v273_v39 }
 0x24f   :  { %v276_v42 = vadd.f32 %v275_v41, %v271_v40  ;;  %v150_v41 = vadd.f32 %v1096_v8, %v1392_v25 }
 0x251   :  { %278 = vrot.lane.b32.xlu0 %v276_v42, %s1301_s3 }
 0x2c3   :  { %v1399_v43 = vpop.permute.xlu0 %278 }
 0x2c4   :  { %1123 = vmatmul.mubr.msk.f32.vlgmr.msra.gmra.mrb[2].mxu1 %vm174_vm2, %v1399_v43 }
 0x2c5   :  { %1215 = vmatpush3.bf16.msra.mxu1 %v1345_v5  ;;  %1144 = vmatprep.mubr.msk.f32.mxu1 %vm1298_vm1, %v1299_v4 }
 0x2c6   :  { %1216 = vmatprep.subr.bf16.mxu1 %v1297_v0 }
 0x2c9   :  { %1218 = vmatpush3.bf16.msra.mxu1 %v1360_v11 }
 0x2ca   :  { %1225 = vmatprep.subr.bf16.mxu1 %v1297_v0 }
 0x397   :  { %v348_v44 = vpop.f32.mrb[2].mxu1 }
 0x398   :  { %v349_v45 = vadd.f32 %v348_v44, %v1388_v18  ;;  %v1124_v46 = vpop.f32.mrb[3].mxu1 }
 0x39a   :  { %360 = vrot.lane.b32.xlu1 %v349_v45, %s1300_s10  ;;  %v352_v48 = vadd.f32 %v349_v45, %v140_v47 }
 0x39c   :  { %v1024_v49 = vmul.f32 -1.442695, %v352_v48 }
 0x39e   :  { %1255 = vpow2.f32 %v1024_v49 }
 0x3a8   :  { %v1256_v50 = vpop.eup %1255 }
 0x3a9   :  { %v356_v51 = vadd.f32 1.0, %v1256_v50 }
 0x3ab   :  { %1257 = vrcp.f32 %v356_v51 }
 0x3b5   :  { %v1258_v52 = vpop.eup %1257 }
 0x3b6   :  { %v370_v1 = vsub.f32 1.0, %v1258_v52  ;;  %v376_v3 = vmul.f32 %v1258_v52, %v276_v42 }
 0x40c   :  { %v361_v53 = vpop.permute.xlu1 %360 }
 0x40d   :  { %v363_v54 = vmul.f32 %v1258_v52, %v361_v53 }
 0x40f   :  { %365 = vrot.lane.b32.xlu0 %v363_v54, %s1300_s10 }
 0x481   :  { %v366_v55 = vpop.permute.xlu0 %365 }
 0x482   :  { %v368_v56 = vadd.f32 %v366_v55, %v140_v47 }
 0x484   :  { %1259 = vtanh.f32 %v368_v56 }
 0x48e   :  { %v1260_v63 = vpop.eup %1259 }
 0x48f   :  { %372 = vrot.lane.b32.xlu1 %v1260_v63, %s1301_s3 }
 0x501   :  { %v373_v2 = vpop.permute.xlu1 %372 }
 0x502   :  { %v375_v6 = vmul.f32 %v373_v2, %v370_v1 }
 0x504   :  { %v1440_v7 = vadd.f32 %v376_v3, %v375_v6 }
 0x506   :  { %379 = vrot.lane.b32.xlu0 %v1440_v7, %s1301_s3 }
 0x578   :  { %v380_v15 = vpop.permute.xlu0 %379 }
 0x579   :  { %1134 = vmatmul.mubr.msk.f32.vlgmr.msra.gmra.mrb[8].mxu0 %vm174_vm2, %v380_v15 }
 0x57a   :  { %1221 = vmatpush3.bf16.msra.mxu0 %v1345_v5  ;;  %1155 = vmatprep.mubr.msk.f32.mxu0 %vm1298_vm1, %v1299_v4 }
 0x57b   :  { %1222 = vmatprep.subr.bf16.mxu0 %v1297_v0 }
 0x57e   :  { %1224 = vmatpush3.bf16.msra.mxu0 %v1360_v11 }
 0x57f   :  { %1231 = vmatprep.subr.bf16.mxu0 %v1297_v0 }
 0x64c   :  { %v449_v16 = vpop.f32.mrb[8].mxu0 }
 0x64d   :  { %v450_v17 = vadd.f32 %v449_v16, %v1388_v18  ;;  %v1135_v19 = vpop.f32.mrb[9].mxu0 }
 0x64f   :  { %461 = vrot.lane.b32.xlu1 %v450_v17, %s1300_s10  ;;  %v453_v21 = vadd.f32 %v450_v17, %v145_v20 }
 0x651   :  { %v1026_v22 = vmul.f32 -1.442695, %v453_v21 }
 0x653   :  { %1261 = vpow2.f32 %v1026_v22 }
 0x65d   :  { %v1262_v23 = vpop.eup %1261 }
 0x65e   :  { %v457_v24 = vadd.f32 1.0, %v1262_v23 }
 0x660   :  { %1263 = vrcp.f32 %v457_v24 }
 0x66a   :  { %v1264_v26 = vpop.eup %1263 }
 0x66b   :  { %v471_v32 = vsub.f32 1.0, %v1264_v26  ;;  %v477_v34 = vmul.f32 %v1264_v26, %v1440_v7 }
 0x6c1   :  { %v462_v27 = vpop.permute.xlu1 %461 }
 0x6c2   :  { %v464_v28 = vmul.f32 %v1264_v26, %v462_v27 }
 0x6c4   :  { %466 = vrot.lane.b32.xlu0 %v464_v28, %s1300_s10  ;;  %v160_v28 = vadd.f32 %v1444_v10, %v1392_v25 }
 0x736   :  { %v467_v29 = vpop.permute.xlu0 %466 }
 0x737   :  { %v469_v30 = vadd.f32 %v467_v29, %v145_v20 }
 0x739   :  { %1265 = vtanh.f32 %v469_v30 }
 0x743   :  { %v1266_v31 = vpop.eup %1265 }
 0x744   :  { %473 = vrot.lane.b32.xlu1 %v1266_v31, %s1301_s3 }
 0x7b6   :  { %v474_v33 = vpop.permute.xlu1 %473 }
 0x7b7   :  { %v476_v35 = vmul.f32 %v474_v33, %v471_v32 }
 0x7b9   :  { %v1465_v36 = vadd.f32 %v477_v34, %v476_v35 }
 0x7bb   :  { %480 = vrot.lane.b32.xlu0 %v1465_v36, %s1301_s3 }
 0x82d   :  { %v481_v37 = vpop.permute.xlu0 %480 }
 0x82e   :  { %1145 = vmatmul.mubr.msk.f32.vlgmr.msra.gmra.mrb[4].mxu1 %vm174_vm2, %v481_v37 }
 0x82f   :  { %1227 = vmatpush3.bf16.msra.mxu1 %v1345_v5  ;;  %1166 = vmatprep.mubr.msk.f32.mxu1 %vm1298_vm1, %v1299_v4 }
 0x830   :  { %1228 = vmatprep.subr.bf16.mxu1 %v1297_v0 }
 0x833   :  { %1230 = vmatpush3.bf16.msra.mxu1 %v1360_v11 }
 0x834   :  { %1237 = vmatprep.subr.bf16.mxu1 %v1297_v0 }
 0x901   :  { %v550_v38 = vpop.f32.mrb[4].mxu1 }
 0x902   :  { %v551_v39 = vadd.f32 %v550_v38, %v1388_v18  ;;  %v1146_v40 = vpop.f32.mrb[5].mxu1 }
 0x904   :  { %562 = vrot.lane.b32.xlu1 %v551_v39, %s1300_s10  ;;  %v554_v42 = vadd.f32 %v551_v39, %v150_v41 }
 0x906   :  { %v1028_v44 = vmul.f32 -1.442695, %v554_v42 }
 0x908   :  { %1267 = vpow2.f32 %v1028_v44 }
 0x912   :  { %v1268_v45 = vpop.eup %1267 }
 0x913   :  { %v558_v46 = vadd.f32 1.0, %v1268_v45  ;;  %v165_v45 = vadd.f32 %v1450_v14, %v1392_v25 }
 0x915   :  { %1269 = vrcp.f32 %v558_v46 }
 0x91f   :  { %v1270_v47 = vpop.eup %1269 }
 0x920   :  { %v572_v53 = vsub.f32 1.0, %v1270_v47  ;;  %v578_v55 = vmul.f32 %v1270_v47, %v1465_v36 }
 0x976   :  { %v563_v48 = vpop.permute.xlu1 %562 }
 0x977   :  { %v565_v49 = vmul.f32 %v1270_v47, %v563_v48 }
 0x979   :  { %567 = vrot.lane.b32.xlu0 %v565_v49, %s1300_s10 }
 0x9eb   :  { %v568_v50 = vpop.permute.xlu0 %567 }
 0x9ec   :  { %v570_v51 = vadd.f32 %v568_v50, %v150_v41 }
 0x9ee   :  { %1271 = vtanh.f32 %v570_v51 }
 0x9f8   :  { %v1272_v52 = vpop.eup %1271 }
 0x9f9   :  { %574 = vrot.lane.b32.xlu1 %v1272_v52, %s1301_s3 }
 0xa6b   :  { %v575_v54 = vpop.permute.xlu1 %574 }
 0xa6c   :  { %v577_v56 = vmul.f32 %v575_v54, %v572_v53 }
 0xa6e   :  { %v1482_v57 = vadd.f32 %v578_v55, %v577_v56 }
 0xa70   :  { %594 = vrot.lane.b32.xlu0 %v1482_v57, %s1301_s3 }
 0xae2   :  { %v595_v58 = vpop.permute.xlu0 %594 }
 0xae3   :  { %1156 = vmatmul.mubr.msk.f32.vlgmr.msra.gmra.mrb[10].mxu0 %vm174_vm2, %v595_v58 }
 0xae4   :  { %1233 = vmatpush3.bf16.msra.mxu0 %v1345_v5  ;;  %1177 = vmatprep.mubr.msk.f32.mxu0 %vm1298_vm1, %v1299_v4 }
 0xae5   :  { %1234 = vmatprep.subr.bf16.mxu0 %v1297_v0 }
 0xae8   :  { %1236 = vmatpush3.bf16.msra.mxu0 %v1360_v11 }
 0xbb6   :  { %v664_v59 = vpop.f32.mrb[10].mxu0 }
 0xbb7   :  { %v665_v60 = vadd.f32 %v664_v59, %v1388_v18  ;;  %v1157_v61 = vpop.f32.mrb[11].mxu0 }
 0xbb9   :  { %676 = vrot.lane.b32.xlu1 %v665_v60, %s1300_s10  ;;  %v668_v63 = vadd.f32 %v665_v60, %v155_v62 }
 0xbbb   :  { %v1030_v1 = vmul.f32 -1.442695, %v668_v63 }
 0xbbd   :  { %1273 = vpow2.f32 %v1030_v1 }
 0xbc7   :  { %v1274_v2 = vpop.eup %1273 }
 0xbc8   :  { %v672_v3 = vadd.f32 1.0, %v1274_v2  ;;  %v170_v2 = vadd.f32 %v1448_v13, %v1392_v25  ;;  %v588_v13 = vsel %vm174_vm2, %v1399_v43, %v1440_v7 }
 0xbca   :  { %1275 = vrcp.f32 %v672_v3 }
 0xbd4   :  { %v1276_v6 = vpop.eup %1275 }
 0xbd5   :  { %v686_v19 = vsub.f32 1.0, %v1276_v6  ;;  %v692_v12 = vmul.f32 %v1276_v6, %v1482_v57 }
 0xc2b   :  { %v677_v8 = vpop.permute.xlu1 %676 }
 0xc2c   :  { %v679_v9 = vmul.f32 %v1276_v6, %v677_v8 }
 0xc2e   :  { %681 = vrot.lane.b32.xlu0 %v679_v9, %s1300_s10 }
 0xca0   :  { %v682_v15 = vpop.permute.xlu0 %681 }
 0xca1   :  { %v684_v16 = vadd.f32 %v682_v15, %v155_v62 }
 0xca3   :  { %1277 = vtanh.f32 %v684_v16 }
 0xcad   :  { %v1278_v17 = vpop.eup %1277 }
 0xcae   :  { %688 = vrot.lane.b32.xlu1 %v1278_v17, %s1301_s3 }
 0xd20   :  { %v689_v20 = vpop.permute.xlu1 %688 }
 0xd21   :  { %v691_v21 = vmul.f32 %v689_v20, %v686_v19 }
 0xd23   :  { %v693_v22 = vadd.f32 %v692_v12, %v691_v21 }
 0xd25   :  { %695 = vrot.lane.b32.xlu0 %v693_v22, %s1301_s3 }
 0xd97   :  { %v1500_v23 = vpop.permute.xlu0 %695 }
 0xd98   :  { %1167 = vmatmul.mubr.msk.f32.vlgmr.msra.gmra.mrb[6].mxu1 %vm174_vm2, %v1500_v23 }
 0xd99   :  { %1239 = vmatpush3.bf16.msra.mxu1 %v1345_v5  ;;  %1188 = vmatprep.mubr.msk.f32.mxu1 %vm1298_vm1, %v1299_v4 }
 0xd9a   :  { %1240 = vmatprep.subr.bf16.mxu1 %v1297_v0 }
 0xd9d   :  { %1242 = vmatpush3.bf16.msra.mxu1 %v1360_v11 }
 0xe6b   :  { %v765_v24 = vpop.f32.mrb[6].mxu1 }
 0xe6c   :  { %v766_v26 = vadd.f32 %v765_v24, %v1388_v18  ;;  %v1168_v27 = vpop.f32.mrb[7].mxu1 }
 0xe6e   :  { %777 = vrot.lane.b32.xlu1 %v766_v26, %s1300_s10  ;;  %v769_v29 = vadd.f32 %v766_v26, %v160_v28 }
 0xe70   :  { %v1032_v30 = vmul.f32 -1.442695, %v769_v29 }
 0xe72   :  { %1279 = vpow2.f32 %v1032_v30 }
 0xe7c   :  { %v1280_v5 = vpop.eup %1279 }
 0xe7d   :  { %v773_v31 = vadd.f32 1.0, %v1280_v5 }
 0xe7f   :  { %1281 = vrcp.f32 %v773_v31 }
 0xe89   :  { %v1282_v4 = vpop.eup %1281 }
 0xe8a   :  { %v787_v35 = vsub.f32 1.0, %v1282_v4  ;;  %v793_v10 = vmul.f32 %v1282_v4, %v693_v22 }
 0xee0   :  { %v778_v32 = vpop.permute.xlu1 %777 }
 0xee1   :  { %v780_v0 = vmul.f32 %v1282_v4, %v778_v32 }
 0xee3   :  { %782 = vrot.lane.b32.xlu0 %v780_v0, %s1300_s10 }
 0xf55   :  { %v783_v11 = vpop.permute.xlu0 %782 }
 0xf56   :  { %v785_v33 = vadd.f32 %v783_v11, %v160_v28 }
 0xf58   :  { %1283 = vtanh.f32 %v785_v33 }
 0xf62   :  { %v1284_v34 = vpop.eup %1283 }
 0xf63   :  { %789 = vrot.lane.b32.xlu1 %v1284_v34, %s1301_s3 }
 0xfd5   :  { %v790_v37 = vpop.permute.xlu1 %789 }
 0xfd6   :  { %v792_v38 = vmul.f32 %v790_v37, %v787_v35 }
 0xfd8   :  { %v1515_v39 = vadd.f32 %v793_v10, %v792_v38 }
 0xfda   :  { %796 = vrot.lane.b32.xlu0 %v1515_v39, %s1301_s3  ;;  %v1005_v7 = vsel %vm174_vm2, %v1500_v23, %v1515_v39 }
0x104c   :  { %v797_v40 = vpop.permute.xlu0 %796 }
0x104d   :  { %1178 = vmatmul.mubr.msk.f32.vlgmr.msra.gmra.mrb[12].mxu0 %vm174_vm2, %v797_v40 }
0x1120   :  { %v866_v41 = vpop.f32.mrb[12].mxu0 }
0x1121   :  { %v867_v42 = vadd.f32 %v866_v41, %v1388_v18  ;;  %v1179_v44 = vpop.f32.mrb[13].mxu0 }
0x1123   :  { %878 = vrot.lane.b32.xlu1 %v867_v42, %s1300_s10  ;;  %v870_v46 = vadd.f32 %v867_v42, %v165_v45 }
0x1125   :  { %v1034_v47 = vmul.f32 -1.442695, %v870_v46 }
0x1127   :  { %1285 = vpow2.f32 %v1034_v47 }
0x1131   :  { %v1286_v48 = vpop.eup %1285 }
0x1132   :  { %v874_v49 = vadd.f32 1.0, %v1286_v48 }
0x1134   :  { %1287 = vrcp.f32 %v874_v49 }
0x113e   :  { %v1288_v50 = vpop.eup %1287 }
0x113f   :  { %v888_v56 = vsub.f32 1.0, %v1288_v50  ;;  %v894_v14 = vmul.f32 %v1288_v50, %v1515_v39 }
0x1195   :  { %v879_v51 = vpop.permute.xlu1 %878 }
0x1196   :  { %v881_v52 = vmul.f32 %v1288_v50, %v879_v51 }
0x1198   :  { %883 = vrot.lane.b32.xlu0 %v881_v52, %s1300_s10 }
0x120a   :  { %v884_v53 = vpop.permute.xlu0 %883 }
0x120b   :  { %v886_v54 = vadd.f32 %v884_v53, %v165_v45 }
0x120d   :  { %1289 = vtanh.f32 %v886_v54 }
0x1217   :  { %v1290_v55 = vpop.eup %1289 }
0x1218   :  { %890 = vrot.lane.b32.xlu1 %v1290_v55, %s1301_s3 }
0x128a   :  { %v891_v58 = vpop.permute.xlu1 %890 }
0x128b   :  { %v893_v59 = vmul.f32 %v891_v58, %v888_v56 }
0x128d   :  { %v895_v60 = vadd.f32 %v894_v14, %v893_v59 }
0x128f   :  { %897 = vrot.lane.b32.xlu0 %v895_v60, %s1301_s3 }
0x1301   :  { %v898_v61 = vpop.permute.xlu0 %897 }
0x1302   :  { %1189 = vmatmul.mubr.msk.f32.vlgmr.msra.gmra.mrb[8].mxu1 %vm174_vm2, %v898_v61 }
0x13d5   :  { %v967_v62 = vpop.f32.mrb[8].mxu1 }
0x13d6   :  { %v968_v63 = vadd.f32 %v967_v62, %v1388_v18  ;;  %v1190_v1 = vpop.f32.mrb[9].mxu1 }
0x13d8   :  { %979 = vrot.lane.b32.xlu1 %v968_v63, %s1300_s10  ;;  %v971_v3 = vadd.f32 %v968_v63, %v170_v2 }
0x13da   :  { %v1036_v6 = vmul.f32 -1.442695, %v971_v3 }
0x13dc   :  { %1291 = vpow2.f32 %v1036_v6 }
0x13e6   :  { %v1292_v8 = vpop.eup %1291 }
0x13e7   :  { %v975_v9 = vadd.f32 1.0, %v1292_v8 }
0x13e9   :  { %1293 = vrcp.f32 %v975_v9 }
0x13f3   :  { %v1294_v15 = vpop.eup %1293 }
0x13f4   :  { %v995_v24 = vmul.f32 %v1294_v15, %v895_v60 }
0x144a   :  { %v980_v16 = vpop.permute.xlu1 %979 }
0x144b   :  { %v982_v17 = vmul.f32 %v1294_v15, %v980_v16 }
0x144d   :  { %984 = vrot.lane.b32.xlu0 %v982_v17, %s1300_s10 }
0x1451   :  { %581 = vrot.lane.b32.xlu0 %v1465_v36, %s1302_s11 }
0x1455   :  { %585 = vrot.lane.b32.xlu0 %v1482_v57, %s1300_s10  ;;  %v989_v57 = vsub.f32 1.0, %v1294_v15 }
0x14bf   :  { %v985_v18 = vpop.permute.xlu0 %984 }
0x14c0   :  { %v987_v19 = vadd.f32 %v985_v18, %v170_v2 }
0x14c2   :  { %1295 = vtanh.f32 %v987_v19 }
0x14c3   :  { %v582_v25 = vpop.permute.xlu0 %581 }
0x14c4   :  { %v590_v20 = vsel %vm589_vm3, %v588_v13, %v582_v25 }
0x14c7   :  { %v586_v12 = vpop.permute.xlu0 %585 }
0x14c8   :  { %v592_v21 = vsel %vm591_vm4, %v590_v20, %v586_v12 }
0x14c9   :  { %593 = vst [vmem:[%s1562_s5] sm:$0xff] %v592_v21 }
0x14cc   :  { %v1296_v36 = vpop.eup %1295 }
0x14cd   :  { %991 = vrot.lane.b32.xlu1 %v1296_v36, %s1301_s3 }
0x14d1   :  { %998 = vrot.lane.b32.xlu1 %v895_v60, %s1302_s11 }
0x153f   :  { %v992_v22 = vpop.permute.xlu1 %991 }
0x1540   :  { %v994_v26 = vmul.f32 %v992_v22, %v989_v57 }
0x1542   :  { %v996_v27 = vadd.f32 %v995_v24, %v994_v26 }
0x1543   :  { %v999_v43 = vpop.permute.xlu1 %998 }
0x1544   :  { %1002 = vrot.lane.b32.xlu1 %v996_v27, %s1300_s10  ;;  %v1006_v28 = vsel %vm589_vm3, %v1005_v7, %v999_v43 }
0x15b6   :  { %v1003_v29 = vpop.permute.xlu1 %1002 }
0x15b7   :  { %v1007_v30 = vsel %vm591_vm4, %v1006_v28, %v1003_v29 }
0x15b8   :  { %1008 = vst [vmem:[%s1562_s5 + $0x8] sm:$0xff] %v1007_v30 }

</bundles_post_ra>
